<compile_context>
chip_gen: v7x
topology: tpu7x:2x2x1
jax: 0.10.0
libtpu: 0.0.40
codegen_flags: <defaults>
</compile_context>

<pallas_src>
import functools
import math

import jax
import jax.numpy as jnp
from jax.experimental import pallas as pl
from jax.experimental.pallas import tpu as pltpu

_LANE = 128
_SUBLANE = 8


def _round_up(x: int, m: int) -> int:
    return ((x + m - 1) // m) * m


def _router_kernel(x_ref, w_ref, o_ref, *, num_experts: int, round_mix_dtype):
    e = num_experts
    x = x_ref[...]                                   # [tr, H]
    w = w_ref[...]                                   # [H, 3E]
    # QKV projection on the MXU with fp32 accumulation.
    mix = jnp.dot(x, w, preferred_element_type=jnp.float32)      # [tr, 3E]
    if round_mix_dtype is not None:
        # torch runs the linear in the model dtype and only then `.float()`s
        # q/k/v; mimic that rounding step for low-precision inputs.
        mix = mix.astype(round_mix_dtype).astype(jnp.float32)
    q = mix[:, 0 * e:1 * e]                          # [tr, E]
    k = mix[:, 1 * e:2 * e]
    v = mix[:, 2 * e:3 * e]
    # attn_weights[t, i, j] = q[t, i] * k[t, j]  (per-token rank-1 logits).
    logits = q[:, :, None] * k[:, None, :]           # [tr, E, E] fp32
    m = jnp.max(logits, axis=-1, keepdims=True)
    p = jnp.exp(logits - m)
    denom = jnp.sum(p, axis=-1, keepdims=True)
    attn = p / denom                                 # softmax over the key axis
    out = jnp.sum(attn * v[:, None, :], axis=-1)     # [tr, E]
    o_ref[...] = out.astype(o_ref.dtype)


def _choose_row_tile(rows: int, hidden: int, num_experts: int,
                     x_itemsize: int, w_itemsize: int) -> int:
    """Largest row tile (multiple of 8, <= 512) whose per-step working set fits
    a conservative VMEM budget on every generation (v7x: 64 MiB/TC total)."""
    e = num_experts
    e3 = 3 * e
    budget = 24 * 1024 * 1024
    # Weight block is revisited every step; count it double-buffered anyway.
    fixed = 2 * hidden * e3 * w_itemsize
    e_lanes = _round_up(e, _LANE)
    e_subl = _round_up(e, _SUBLANE)
    per_row = (
        2 * hidden * x_itemsize              # input block, double buffered
        + 2 * e * 4                          # fp32 output block, double buffered
        + _round_up(e3, _LANE) * 4           # mix intermediate (lane padded)
        + 4 * e_subl * e_lanes * 4           # [E, E] softmax intermediates (padded)
    )
    tr = (budget - fixed) // per_row
    tr = int(max(_SUBLANE, min(512, tr)))
    tr = (tr // _SUBLANE) * _SUBLANE
    if tr >= rows:
        return rows                          # small input: one VMEM-bounded block
    return tr
    # TODO(synk): for extremely wide hidden (>~32K) add a reduction grid axis
    # over hidden with an fp32 accumulator instead of loading the full row.


def parallel_attention_router(hidden_states: jax.Array,
                              qkv_weight: jax.Array) -> jax.Array:
    """ParallelAttention_router forward.

    hidden_states: [..., hidden_size]  (leading dims flattened to tokens,
                   matching vLLM's [num_tokens, hidden] convention)
    qkv_weight:    [3 * num_experts, hidden_size]  (torch nn.Linear layout)
    returns:       [..., num_experts] float32 router scores
    """
    lead = hidden_states.shape[:-1]
    hidden = hidden_states.shape[-1]
    rows = math.prod(lead) if lead else 1
    e3, h_w = qkv_weight.shape
    assert h_w == hidden and e3 % 3 == 0, (qkv_weight.shape, hidden)
    num_experts = e3 // 3

    x2d = hidden_states.reshape(rows, hidden)
    w_t = qkv_weight.T                       # [hidden, 3E]: lane-dense for MXU

    mix_dtype = jnp.promote_types(hidden_states.dtype, qkv_weight.dtype)
    round_mix_dtype = (mix_dtype
                       if (mix_dtype == jnp.bfloat16 or mix_dtype == jnp.float16)
                       else None)

    tr = _choose_row_tile(rows, hidden, num_experts,
                          x2d.dtype.itemsize, w_t.dtype.itemsize)
    grid = (pl.cdiv(rows, tr),)

    kernel = functools.partial(_router_kernel, num_experts=num_experts,
                               round_mix_dtype=round_mix_dtype)

    out2d = pl.pallas_call(
        kernel,
        out_shape=jax.ShapeDtypeStruct((rows, num_experts), jnp.float32),
        grid_spec=pltpu.PrefetchScalarGridSpec(
            num_scalar_prefetch=0,
            grid=grid,
            in_specs=[
                pl.BlockSpec((tr, hidden), lambda i: (i, 0)),
                pl.BlockSpec((hidden, e3), lambda i: (0, 0)),
            ],
            out_specs=pl.BlockSpec((tr, num_experts), lambda i: (i, 0)),
        ),
        compiler_params=pltpu.CompilerParams(
            dimension_semantics=("parallel",),
            # Above v5e's 16 MiB default scoped limit, well under v7x's 64 MiB
            # physical VMEM; actual per-step usage is bounded to ~24 MiB above.
            vmem_limit_bytes=48 * 1024 * 1024,
        ),
    )(x2d, w_t)

    return out2d.reshape(lead + (num_experts,))


def _reference_router(hidden_states, qkv_weight):
    """Pure-JAX mirror of the PyTorch forward (full fp32 precision)."""
    hp = jax.lax.Precision.HIGHEST
    mix = jnp.matmul(hidden_states, qkv_weight.T, precision=hp)
    q, k, v = jnp.split(mix, 3, axis=-1)
    q = q.astype(jnp.float32)[..., None]             # [T, E, 1]
    k = k.astype(jnp.float32)[..., None]
    v = v.astype(jnp.float32)[..., None]
    attn = jnp.matmul(q, jnp.swapaxes(k, -1, -2), precision=hp)   # [T, E, E]
    attn = jax.nn.softmax(attn, axis=-1)
    out = jnp.matmul(attn, v, precision=hp)          # [T, E, 1]
    return out[..., 0]


if __name__ == "__main__":
    key = jax.random.PRNGKey(0)
    num_tokens, hidden_size, num_experts = 8, 32, 8

    kx, kw = jax.random.split(key)
    x = jax.random.normal(kx, (num_tokens, hidden_size), dtype=jnp.float32)
    w = jax.random.normal(kw, (3 * num_experts, hidden_size),
                          dtype=jnp.float32) * 0.05
    # Round test data to bf16-representable values so the check is insensitive
    # to MXU matmul pass-precision differences between kernel and reference.
    x = x.astype(jnp.bfloat16).astype(jnp.float32)
    w = w.astype(jnp.bfloat16).astype(jnp.float32)

    out = parallel_attention_router(x, w)
    out = jax.block_until_ready(out)

    ref = _reference_router(x, w)
    assert out.shape == ref.shape, (out.shape, ref.shape)
    assert out.dtype == jnp.float32, out.dtype
    max_err = float(jnp.max(jnp.abs(out - ref)))
    assert jnp.allclose(out, ref, atol=1e-5, rtol=1e-4), f"mismatch: {max_err}"

    print("KERNEL_OK")
</pallas_src>

<mosaic_0001>
module attributes {stable_mosaic.version = 11 : i64} {
  func.func @_router_kernel(%arg0: i32, %arg1: memref<8x32xf32, #tpu.memory_space<vmem>>, %arg2: memref<32x24xf32, #tpu.memory_space<vmem>>, %arg3: memref<8x8xf32, #tpu.memory_space<vmem>>) attributes {dimension_semantics = [#tpu.dimension_semantics<parallel>], iteration_bounds = array<i64: 1>, scalar_prefetch = 0 : i64, scratch_operands = 0 : i64, tpu.core_type = #tpu.core_type<tc>, window_params = [{transform_indices = @transform_0, window_bounds = array<i64: 8, 32>}, {pipeline_mode = #tpu.pipeline_mode<synchronous>, transform_indices = @transform_1, window_bounds = array<i64: 32, 24>}, {transform_indices = @transform_2, window_bounds = array<i64: 8, 8>}]} {
    %c0 = arith.constant 0 : index
    %c0_0 = arith.constant 0 : index
    %0 = vector.load %arg1[%c0, %c0_0] : memref<8x32xf32, #tpu.memory_space<vmem>>, vector<8x32xf32>
    %c0_1 = arith.constant 0 : index
    %c0_2 = arith.constant 0 : index
    %1 = vector.load %arg2[%c0_1, %c0_2] : memref<32x24xf32, #tpu.memory_space<vmem>>, vector<32x24xf32>
    %cst = arith.constant dense<0.000000e+00> : vector<8x24xf32>
    %2 = tpu.matmul %0, %1, %cst {dimension_numbers = #tpu.dot_dimension_numbers<[1], [0], [0], [1], [0, 0, 1, 1], [], []>} : vector<8x32xf32>, vector<32x24xf32>, vector<8x24xf32> -> vector<8x24xf32>
    %3 = vector.extract_strided_slice %2 {offsets = [0, 0], sizes = [8, 8], strides = [1, 1]} : vector<8x24xf32> to vector<8x8xf32>
    %4 = vector.extract_strided_slice %2 {offsets = [0, 8], sizes = [8, 8], strides = [1, 1]} : vector<8x24xf32> to vector<8x8xf32>
    %5 = vector.extract_strided_slice %2 {offsets = [0, 16], sizes = [8, 8], strides = [1, 1]} : vector<8x24xf32> to vector<8x8xf32>
    %6 = vector.shape_cast %3 : vector<8x8xf32> to vector<8x8x1xf32>
    %7 = vector.shape_cast %4 : vector<8x8xf32> to vector<8x1x8xf32>
    %8 = vector.broadcast %6 : vector<8x8x1xf32> to vector<8x8x8xf32>
    %9 = vector.broadcast %7 : vector<8x1x8xf32> to vector<8x8x8xf32>
    %10 = arith.mulf %8, %9 : vector<8x8x8xf32>
    %cst_3 = arith.constant dense<0xFF800000> : vector<8x8xf32>
    %11 = vector.multi_reduction <maximumf>, %10, %cst_3 [2] : vector<8x8x8xf32> to vector<8x8xf32>
    %12 = vector.shape_cast %11 : vector<8x8xf32> to vector<8x8x1xf32>
    %13 = vector.broadcast %12 : vector<8x8x1xf32> to vector<8x8x8xf32>
    %14 = arith.subf %10, %13 : vector<8x8x8xf32>
    %15 = math.exp %14 : vector<8x8x8xf32>
    %cst_4 = arith.constant dense<0.000000e+00> : vector<8x8xf32>
    %16 = vector.multi_reduction <add>, %15, %cst_4 [2] : vector<8x8x8xf32> to vector<8x8xf32>
    %17 = vector.shape_cast %16 : vector<8x8xf32> to vector<8x8x1xf32>
    %18 = vector.broadcast %17 : vector<8x8x1xf32> to vector<8x8x8xf32>
    %19 = arith.divf %15, %18 : vector<8x8x8xf32>
    %20 = vector.shape_cast %5 : vector<8x8xf32> to vector<8x1x8xf32>
    %21 = vector.broadcast %20 : vector<8x1x8xf32> to vector<8x8x8xf32>
    %22 = arith.mulf %19, %21 : vector<8x8x8xf32>
    %cst_5 = arith.constant dense<0.000000e+00> : vector<8x8xf32>
    %23 = vector.multi_reduction <add>, %22, %cst_5 [2] : vector<8x8x8xf32> to vector<8x8xf32>
    %c0_6 = arith.constant 0 : index
    %c0_7 = arith.constant 0 : index
    %24 = vector.load %arg3[%c0_6, %c0_7] : memref<8x8xf32, #tpu.memory_space<vmem>>, vector<8x8xf32>
    tpu.vector_store %arg3[%c0_6, %c0_7], %23 {strides = array<i32>} : memref<8x8xf32, #tpu.memory_space<vmem>>, vector<8x8xf32>,
    return
  }
  func.func @transform_0(%arg0: i32) -> (i32, i32) {
    %c0_i32 = arith.constant 0 : i32
    %c0_i32_0 = arith.constant 0 : i32
    return %arg0, %c0_i32 : i32, i32
  }
  func.func @transform_1(%arg0: i32) -> (i32, i32) {
    %c0_i32 = arith.constant 0 : i32
    %c0_i32_0 = arith.constant 0 : i32
    %c0_i32_1 = arith.constant 0 : i32
    return %c0_i32, %c0_i32_0 : i32, i32
  }
  func.func @transform_2(%arg0: i32) -> (i32, i32) {
    %c0_i32 = arith.constant 0 : i32
    %c0_i32_0 = arith.constant 0 : i32
    return %arg0, %c0_i32 : i32, i32
  }
}

</mosaic_0001>

<bundles_post_ra>
// kernel: tpu_custom_call.1
= control target key start
LH: loop header
LB: loop body
LE: loop exit
PB: predicated region body
PF: predicated region fallthrough
CT: control target
= control target key end

     0   :  { %v612_v3 = vmov 0.0|0.0   ;;  %vm613_vm0 = vmmov 0   ;;  %v614_v6 = vmov 0.0   ;;  %s787_s0 = inlined_call_operand.vmem [shape: f32[8,32], index: 0, kind: input, shape index: {}]   ;;  %s788_s1 = inlined_call_operand.vmem [shape: f32[32,24], index: 1, kind: input, shape index: {}]   ;;  %s789_s2 = inlined_call_operand.hbm [shape: f32[8,8], index: 2, kind: output, shape index: {}]  }
   0x1   :  { %v13_v0 = vld [vmem:[%s788_s1] sm:$0xff]  ;;  %v14_v1 = vld [vmem:[%s788_s1 + $0x8] sm:$0xff]  ;;  %v15_v2 = vld [vmem:[%s788_s1 + $0x10] sm:$0xff]  ;;  %544 = vmatprep.subr.bf16.mxu0 %v612_v3  ;;  %541 = vmatprep.mubr.msk.f32.mxu0 %vm613_vm0, %v614_v6 }
   0x2   :  { %v545_v4 = vpack.c.bf16 %v14_v1, %v13_v0  ;;  %v16_v5 = vld [vmem:[%s788_s1 + $0x18] sm:$0xff] }
   0x3   :  { %7 = vsyncpa [#allocation3], 0  ;;  %v548_v7 = vpack.c.bf16 %v16_v5, %v15_v2  ;;  %v12_v8 = vld [vmem:[%s787_s0] sm:$0xff]  ;;  %vm17_vm1 = vcmask 261120   ;;  %v91_v9 = vlaneseq  ;;  %v615_v10 = vmov 1966171168  }
   0x4   :  { %546 = vmatpush3.bf16.msra.mxu0 %v545_v4  ;;  %v150_v11 = vunpack.c.l.s4 %v615_v10  ;;  %vm245_vm2 = vcmask 130112   ;;  %s616_s0 = smov 120   ;;  %vm326_vm3 = vcmask 64512   ;;  %vm497_vm4 = vcmask 1041409   ;;  %s617_s1 = smov [#allocation2]  }
   0x5   :  { %547 = vmatprep.subr.bf16.mxu0 %v612_v3  ;;  %v649_v12 = vshrl.u32 %v91_v9, 7  ;;  %vm499_vm5 = vcmask 1042434   ;;  %vm501_vm6 = vcmask 1043459   ;;  %vm503_vm7 = vcmask 1044484   ;;  %s519_s19 = sshll.u32 %s617_s1, 4  ;;  %s520_s19 = int_to_ptr.vmem [resolvable:$true] %s519_s19 }
   0x6   :  { %v151_v13 = vunpack.c.0.s8 %v150_v11  ;;  %vm505_vm8 = vcmask 1045509   ;;  %vm507_vm9 = vcmask 1046534   ;;  %vm509_vm10 = vcmask 1047559   ;;  %s588_s20 = scalar_lea.vmem %s520_s19, 128  ;;  %p593_p1 = scmp.lt.s32.totalorder %s520_s19, %s520_s19 }
   0x7   :  { %v107_v14 = vsub.s32 2, %v649_v12  ;;  %v93_v15 = vsub.s32 0, %v649_v12  ;;  %v114_v18 = vsub.s32 3, %v649_v12  ;;  %v100_v22 = vsub.s32 1, %v649_v12  ;;  %p589_p0 = scmp.ne.s32.totalorder %s520_s19, %s588_s20  ;;  %p594_p2 = scmp.lt.s32.totalorder %s588_s20, %s588_s20 }
   0x8   :  { %549 = vmatpush3.bf16.msra.mxu0 %v548_v7  ;;  %v154_v16 = vsub.s32 %v151_v13, %v649_v12  ;;  %v128_v26 = vsub.s32 5, %v649_v12  ;;  %v121_v27 = vsub.s32 4, %v649_v12  ;;  %v142_v32 = vsub.s32 7, %v649_v12 }
   0x9   :  { %v135_v37 = vsub.s32 6, %v649_v12  ;;  %p595_p3 = por %p594_p2, %p593_p1 }
   0xb   :  { %542 = vmatmul.mubr.msk.f32.vlgmr.msra.gmra.mrb[0].mxu0 %vm17_vm1, %v12_v8  ;;  %p596_p4 = pnand %p595_p3, %p589_p0 }
  0xde   :  { %v87_v17 = vpop.f32.mrb[0].mxu0 }
  0xdf   :  { %v543_v19 = vpop.f32.mrb[1].mxu0  ;;  %v108_v20 = vrot.slane %v87_v17, %v107_v14  ;;  %v94_v21 = vrot.slane %v87_v17, %v93_v15  ;;  %v155_v23 = vrot.slane %v87_v17, %v154_v16  ;;  %v148_v24 = vcombine.high %v87_v17, %v87_v17 }
  0xe0   :  { %v115_v25 = vrot.slane %v87_v17, %v114_v18  ;;  %v101_v28 = vrot.slane %v87_v17, %v100_v22  ;;  %v129_v36 = vrot.slane %v87_v17, %v128_v26  ;;  %v122_v40 = vrot.slane %v87_v17, %v121_v27 }
  0xe1   :  { %110 = vbcast.lane.b32.xlu1 %v108_v20, 256  ;;  %96 = vbcast.lane.b32.xlu0 %v94_v21, 256  ;;  %v171_v29 = vrot.slane %v155_v23, %v154_v16  ;;  %v163_v30 = vcombine.high %v155_v23, %v155_v23  ;;  %v162_v31 = vrot.slane %v148_v24, %v154_v16 }
  0xe2   :  { %v143_v51 = vrot.slane %v87_v17, %v142_v32  ;;  %v136_v52 = vrot.slane %v87_v17, %v135_v37 }
  0xe3   :  { %v193_v33 = vcombine.high %v171_v29, %v171_v29  ;;  %v659_v34 = vrot.slane %v171_v29, %v93_v15  ;;  %v185_v35 = vrot.slane %v163_v30, %v154_v16  ;;  %v164_v38 = vcombine.high %v162_v31, %v162_v31 }
  0xe4   :  { %v178_v39 = vrot.slane %v162_v31, %v154_v16 }
  0xe5   :  { %117 = vbcast.lane.b32.xlu1 %v115_v25, 256  ;;  %103 = vbcast.lane.b32.xlu0 %v101_v28, 256  ;;  %v662_v41 = vrot.slane %v193_v33, %v93_v15  ;;  %v195_v42 = vcombine.high %v185_v35, %v185_v35  ;;  %v664_v43 = vrot.slane %v185_v35, %v93_v15 }
  0xe6   :  { %v192_v44 = vrot.slane %v164_v38, %v154_v16  ;;  %v666_v45 = vrot.slane %v178_v39, %v93_v15  ;;  %v194_v46 = vcombine.high %v178_v39, %v178_v39 }
  0xe7   :  { %v668_v47 = vrot.slane %v195_v42, %v93_v15 }
  0xe8   :  { %v670_v48 = vrot.slane %v192_v44, %v93_v15  ;;  %v196_v49 = vcombine.high %v192_v44, %v192_v44  ;;  %v672_v50 = vrot.slane %v194_v46, %v93_v15 }
  0xe9   :  { %131 = vbcast.lane.b32.xlu1 %v129_v36, 256  ;;  %124 = vbcast.lane.b32.xlu0 %v122_v40, 256 }
  0xea   :  { %v674_v53 = vrot.slane %v196_v49, %v93_v15 }
  0xed   :  { %145 = vbcast.lane.b32.xlu1 %v143_v51, 256  ;;  %138 = vbcast.lane.b32.xlu0 %v136_v52, 256 }
 0x153   :  { %v111_v54 = vpop.permute.xlu1 %110  ;;  %v97_v55 = vpop.permute.xlu0 %96 }
 0x154   :  { %v237_v56 = vmul.f32 %v659_v34, %v97_v55  ;;  %v239_v57 = vmul.f32 %v662_v41, %v111_v54 }
 0x156   :  { %v246_v58 = vsel %vm245_vm2, %v237_v56, -inf  ;;  %v252_v63 = vsel %vm245_vm2, %v239_v57, -inf }
 0x157   :  { %v118_v59 = vpop.permute.xlu1 %117  ;;  %247 = vmax.xlane.f32.xlu0 %v246_v58  ;;  %v104_v60 = vpop.permute.xlu0 %103 }
 0x158   :  { %v238_v61 = vmul.f32 %v664_v43, %v104_v60  ;;  %v240_v62 = vmul.f32 %v668_v47, %v118_v59 }
 0x15a   :  { %v249_v0 = vsel %vm245_vm2, %v238_v61, -inf  ;;  %v255_v5 = vsel %vm245_vm2, %v240_v62, -inf }
 0x15b   :  { %v132_v1 = vpop.permute.xlu1 %131  ;;  %253 = vmax.xlane.f32.xlu0 %v252_v63  ;;  %250 = vmax.xlane.f32.xlu1 %v249_v0  ;;  %v125_v2 = vpop.permute.xlu0 %124 }
 0x15c   :  { %v241_v3 = vmul.f32 %v666_v45, %v125_v2  ;;  %v242_v4 = vmul.f32 %v670_v48, %v132_v1 }
 0x15e   :  { %v258_v6 = vsel %vm245_vm2, %v241_v3, -inf  ;;  %v261_v13 = vsel %vm245_vm2, %v242_v4, -inf }
 0x15f   :  { %v146_v7 = vpop.permute.xlu1 %145  ;;  %256 = vmax.xlane.f32.xlu0 %v255_v5  ;;  %259 = vmax.xlane.f32.xlu1 %v258_v6  ;;  %v139_v8 = vpop.permute.xlu0 %138 }
 0x160   :  { %v243_v10 = vmul.f32 %v672_v50, %v139_v8  ;;  %v244_v11 = vmul.f32 %v674_v53, %v146_v7 }
 0x162   :  { %v264_v14 = vsel %vm245_vm2, %v243_v10, -inf  ;;  %v267_v15 = vsel %vm245_vm2, %v244_v11, -inf }
 0x163   :  { %262 = vmax.xlane.f32.xlu0 %v261_v13  ;;  %265 = vmax.xlane.f32.xlu1 %v264_v14 }
 0x167   :  { %268 = vmax.xlane.f32.xlu0 %v267_v15 }
 0x1e4   :  { %v248_v16 = vpop.xlane.xlu0 %247 }
 0x1e5   :  { %v270_v17 = vsub.f32 %v237_v56, %v248_v16 }
 0x1e7   :  { %v278_v18 = vmul.f32 1.442695, %v270_v17 }
 0x1e8   :  { %v251_v19 = vpop.xlane.xlu1 %250  ;;  %v254_v20 = vpop.xlane.xlu0 %253 }
 0x1e9   :  { %556 = vpow2.f32 %v278_v18  ;;  %v271_v21 = vsub.f32 %v238_v61, %v251_v19  ;;  %v272_v22 = vsub.f32 %v239_v57, %v254_v20 }
 0x1eb   :  { %v280_v23 = vmul.f32 1.442695, %v271_v21  ;;  %v282_v24 = vmul.f32 1.442695, %v272_v22 }
 0x1ec   :  { %v260_v25 = vpop.xlane.xlu1 %259  ;;  %v257_v26 = vpop.xlane.xlu0 %256 }
 0x1ed   :  { %558 = vpow2.f32 %v280_v23  ;;  %v274_v27 = vsub.f32 %v241_v3, %v260_v25  ;;  %v273_v28 = vsub.f32 %v240_v62, %v257_v26 }
 0x1ee   :  { %560 = vpow2.f32 %v282_v24 }
 0x1ef   :  { %v286_v29 = vmul.f32 1.442695, %v274_v27  ;;  %v284_v30 = vmul.f32 1.442695, %v273_v28 }
 0x1f0   :  { %v266_v31 = vpop.xlane.xlu1 %265  ;;  %v263_v32 = vpop.xlane.xlu0 %262 }
 0x1f1   :  { %562 = vpow2.f32 %v286_v29  ;;  %v276_v33 = vsub.f32 %v243_v10, %v266_v31  ;;  %v275_v35 = vsub.f32 %v242_v4, %v263_v32 }
 0x1f2   :  { %564 = vpow2.f32 %v284_v30 }
 0x1f3   :  { %v692_v36 = vpop.eup %556  ;;  %v290_v37 = vmul.f32 1.442695, %v276_v33  ;;  %v288_v38 = vmul.f32 1.442695, %v275_v35 }
 0x1f4   :  { %302 = vrot.lane.b32.xlu1 %v692_v36, %s616_s0  ;;  %v269_v39 = vpop.xlane.xlu0 %268 }
 0x1f5   :  { %566 = vpow2.f32 %v290_v37  ;;  %v277_v40 = vsub.f32 %v244_v11, %v269_v39 }
 0x1f6   :  { %568 = vpow2.f32 %v288_v38 }
 0x1f7   :  { %v696_v42 = vpop.eup %558  ;;  %v292_v44 = vmul.f32 1.442695, %v277_v40 }
 0x1f8   :  { %v698_v46 = vpop.eup %560  ;;  %304 = vrot.lane.b32.xlu0 %v696_v42, %s616_s0 }
 0x1f9   :  { %570 = vpow2.f32 %v292_v44  ;;  %306 = vrot.lane.b32.xlu1 %v698_v46, %s616_s0 }
 0x1fb   :  { %v704_v49 = vpop.eup %562 }
 0x1fc   :  { %v706_v51 = vpop.eup %564  ;;  %310 = vrot.lane.b32.xlu0 %v704_v49, %s616_s0 }
 0x1fd   :  { %308 = vrot.lane.b32.xlu1 %v706_v51, %s616_s0 }
 0x1ff   :  { %v712_v52 = vpop.eup %566 }
 0x200   :  { %v714_v54 = vpop.eup %568  ;;  %314 = vrot.lane.b32.xlu0 %v712_v52, %s616_s0 }
 0x201   :  { %312 = vrot.lane.b32.xlu1 %v714_v54, %s616_s0 }
 0x203   :  { %v720_v55 = vpop.eup %570 }
 0x204   :  { %369 = vrot.lane.b32.xlu0 %v664_v43, %s616_s0 }
 0x205   :  { %316 = vrot.lane.b32.xlu1 %v720_v55, %s616_s0 }
 0x208   :  { %375 = vrot.lane.b32.xlu0 %v666_v45, %s616_s0 }
 0x209   :  { %367 = vrot.lane.b32.xlu1 %v659_v34, %s616_s0 }
 0x20d   :  { %371 = vrot.lane.b32.xlu1 %v662_v41, %s616_s0 }
 0x211   :  { %373 = vrot.lane.b32.xlu1 %v668_v47, %s616_s0 }
 0x215   :  { %377 = vrot.lane.b32.xlu1 %v670_v48, %s616_s0 }
 0x266   :  { %v303_v43 = vpop.permute.xlu1 %302 }
 0x267   :  { %v327_v56 = vsel %vm326_vm3, %v303_v43, 0.0 }
 0x268   :  { %328 = vadd.xlane.f32.xlu0 %v327_v56 }
 0x26a   :  { %v305_v57 = vpop.permute.xlu0 %304 }
 0x26b   :  { %v307_v58 = vpop.permute.xlu1 %306  ;;  %v330_v45 = vsel %vm326_vm3, %v305_v57, 0.0 }
 0x26c   :  { %v333_v34 = vsel %vm326_vm3, %v307_v58, 0.0  ;;  %331 = vadd.xlane.f32.xlu1 %v330_v45 }
 0x26d   :  { %334 = vadd.xlane.f32.xlu0 %v333_v34 }
 0x26e   :  { %v311_v41 = vpop.permute.xlu0 %310 }
 0x26f   :  { %v309_v59 = vpop.permute.xlu1 %308  ;;  %v339_v47 = vsel %vm326_vm3, %v311_v41, 0.0 }
 0x270   :  { %v336_v60 = vsel %vm326_vm3, %v309_v59, 0.0  ;;  %340 = vadd.xlane.f32.xlu1 %v339_v47 }
 0x271   :  { %337 = vadd.xlane.f32.xlu0 %v336_v60 }
 0x272   :  { %v315_v48 = vpop.permute.xlu0 %314 }
 0x273   :  { %v313_v61 = vpop.permute.xlu1 %312  ;;  %v345_v62 = vsel %vm326_vm3, %v315_v48, 0.0  ;;  %v464_v48 = vand.u32 127, %v91_v9 }
 0x274   :  { %v342_v63 = vsel %vm326_vm3, %v313_v61, 0.0  ;;  %346 = vadd.xlane.f32.xlu1 %v345_v62 }
 0x275   :  { %343 = vadd.xlane.f32.xlu0 %v342_v63  ;;  %v467_v62 = vsub.s32 %v464_v48, %v649_v12 }
 0x276   :  { %v370_v4 = vpop.permute.xlu0 %369 }
 0x277   :  { %v317_v0 = vpop.permute.xlu1 %316 }
 0x278   :  { %v348_v1 = vsel %vm326_vm3, %v317_v0, 0.0 }
 0x279   :  { %349 = vadd.xlane.f32.xlu0 %v348_v1 }
 0x27a   :  { %v376_v6 = vpop.permute.xlu0 %375 }
 0x27b   :  { %v368_v2 = vpop.permute.xlu1 %367 }
 0x27f   :  { %v372_v3 = vpop.permute.xlu1 %371 }
 0x283   :  { %v374_v5 = vpop.permute.xlu1 %373 }
 0x285   :  { %381 = vrot.lane.b32.xlu1 %v674_v53, %s616_s0 }
 0x287   :  { %v378_v7 = vpop.permute.xlu1 %377 }
 0x28f   :  { %379 = vrot.lane.b32.xlu0 %v672_v50, %s616_s0 }
 0x2f5   :  { %v329_v8 = vpop.xlane.xlu0 %328 }
 0x2f6   :  { %572 = vrcp.f32 %v329_v8 }
 0x2f9   :  { %v332_v10 = vpop.xlane.xlu1 %331 }
 0x2fa   :  { %574 = vrcp.f32 %v332_v10  ;;  %v335_v11 = vpop.xlane.xlu0 %334 }
 0x2fb   :  { %576 = vrcp.f32 %v335_v11 }
 0x2fd   :  { %v341_v13 = vpop.xlane.xlu1 %340 }
 0x2fe   :  { %578 = vrcp.f32 %v341_v13  ;;  %v338_v14 = vpop.xlane.xlu0 %337 }
 0x2ff   :  { %580 = vrcp.f32 %v338_v14 }
 0x300   :  { %v573_v53 = vpop.eup %572 }
 0x301   :  { %v347_v15 = vpop.xlane.xlu1 %346  ;;  %v352_v50 = vmul.f32 %v573_v53, %v692_v36 }
 0x302   :  { %582 = vrcp.f32 %v347_v15  ;;  %v344_v16 = vpop.xlane.xlu0 %343 }
 0x303   :  { %584 = vrcp.f32 %v344_v16  ;;  %v391_v17 = vmul.f32 %v368_v2, %v352_v50 }
 0x304   :  { %v575_v18 = vpop.eup %574 }
 0x305   :  { %v577_v19 = vpop.eup %576  ;;  %407 = vrot.lane.b32.xlu0 %v391_v17, %s616_s0  ;;  %v354_v20 = vmul.f32 %v575_v18, %v696_v42  ;;  %v382_v42 = vpop.permute.xlu1 %381 }
 0x306   :  { %v350_v21 = vpop.xlane.xlu0 %349  ;;  %v356_v22 = vmul.f32 %v577_v19, %v698_v46 }
 0x307   :  { %586 = vrcp.f32 %v350_v21  ;;  %v392_v23 = vmul.f32 %v370_v4, %v354_v20 }
 0x308   :  { %v579_v24 = vpop.eup %578  ;;  %v393_v25 = vmul.f32 %v372_v3, %v356_v22 }
 0x309   :  { %v581_v26 = vpop.eup %580  ;;  %409 = vrot.lane.b32.xlu1 %v392_v23, %s616_s0  ;;  %v360_v27 = vmul.f32 %v579_v24, %v704_v49 }
 0x30a   :  { %411 = vrot.lane.b32.xlu0 %v393_v25, %s616_s0  ;;  %v358_v28 = vmul.f32 %v581_v26, %v706_v51  ;;  %v380_v35 = vpop.permute.xlu0 %379 }
 0x30b   :  { %v395_v29 = vmul.f32 %v376_v6, %v360_v27 }
 0x30c   :  { %v583_v30 = vpop.eup %582  ;;  %v394_v31 = vmul.f32 %v374_v5, %v358_v28 }
 0x30d   :  { %v585_v32 = vpop.eup %584  ;;  %v364_v33 = vmul.f32 %v583_v30, %v712_v52 }
 0x30e   :  { %415 = vrot.lane.b32.xlu0 %v395_v29, %s616_s0  ;;  %413 = vrot.lane.b32.xlu1 %v394_v31, %s616_s0  ;;  %v362_v36 = vmul.f32 %v585_v32, %v714_v54 }
 0x30f   :  { %v397_v37 = vmul.f32 %v380_v35, %v364_v33 }
 0x310   :  { %v396_v38 = vmul.f32 %v378_v7, %v362_v36 }
 0x311   :  { %v587_v39 = vpop.eup %586 }
 0x312   :  { %417 = vrot.lane.b32.xlu1 %v396_v38, %s616_s0  ;;  %419 = vrot.lane.b32.xlu0 %v397_v37, %s616_s0  ;;  %v366_v40 = vmul.f32 %v587_v39, %v720_v55 }
 0x314   :  { %v398_v44 = vmul.f32 %v382_v42, %v366_v40 }
 0x316   :  { %421 = vrot.lane.b32.xlu1 %v398_v44, %s616_s0 }
 0x377   :  { %v408_v46 = vpop.permute.xlu0 %407 }
 0x378   :  { %v431_v49 = vsel %vm326_vm3, %v408_v46, 0.0 }
 0x379   :  { %432 = vadd.xlane.f32.xlu0 %v431_v49 }
 0x37b   :  { %v410_v51 = vpop.permute.xlu1 %409 }
 0x37c   :  { %v412_v52 = vpop.permute.xlu0 %411  ;;  %v434_v54 = vsel %vm326_vm3, %v410_v51, 0.0 }
 0x37d   :  { %435 = vadd.xlane.f32.xlu1 %v434_v54  ;;  %v437_v43 = vsel %vm326_vm3, %v412_v52, 0.0 }
 0x37e   :  { %438 = vadd.xlane.f32.xlu0 %v437_v43 }
 0x380   :  { %v414_v56 = vpop.permute.xlu1 %413  ;;  %v416_v57 = vpop.permute.xlu0 %415 }
 0x381   :  { %v440_v55 = vsel %vm326_vm3, %v414_v56, 0.0  ;;  %v443_v58 = vsel %vm326_vm3, %v416_v57, 0.0 }
 0x382   :  { %441 = vadd.xlane.f32.xlu0 %v440_v55  ;;  %444 = vadd.xlane.f32.xlu1 %v443_v58 }
 0x384   :  { %v418_v45 = vpop.permute.xlu1 %417  ;;  %v420_v34 = vpop.permute.xlu0 %419 }
 0x385   :  { %v446_v41 = vsel %vm326_vm3, %v418_v45, 0.0  ;;  %v449_v59 = vsel %vm326_vm3, %v420_v34, 0.0 }
 0x386   :  { %447 = vadd.xlane.f32.xlu0 %v446_v41  ;;  %450 = vadd.xlane.f32.xlu1 %v449_v59 }
 0x388   :  { %v422_v47 = vpop.permute.xlu1 %421 }
 0x389   :  { %v452_v60 = vsel %vm326_vm3, %v422_v47, 0.0 }
 0x38a   :  { %453 = vadd.xlane.f32.xlu0 %v452_v60 }
 0x406   :  { %v433_v61 = vpop.xlane.xlu0 %432 }
 0x407   :  { %v468_v2 = vrot.slane %v433_v61, %v467_v62 }
 0x40a   :  { %v436_v63 = vpop.xlane.xlu1 %435 }
 0x40b   :  { %v472_v0 = vrot.slane %v436_v63, %v467_v62  ;;  %v439_v1 = vpop.xlane.xlu0 %438 }
 0x40c   :  { %v476_v3 = vrot.slane %v439_v1, %v467_v62 }
 0x40d   :  { %v498_v4 = vsel %vm497_vm4, %v472_v0, %v468_v2 }
 0x40e   :  { %v500_v8 = vsel %vm499_vm5, %v476_v3, %v498_v4 }
 0x40f   :  { %v445_v5 = vpop.xlane.xlu1 %444  ;;  %v442_v6 = vpop.xlane.xlu0 %441 }
 0x410   :  { %v480_v7 = vrot.slane %v442_v6, %v467_v62  ;;  %v484_v10 = vrot.slane %v445_v5, %v467_v62 }
 0x412   :  { %v502_v11 = vsel %vm501_vm6, %v480_v7, %v500_v8 }
 0x413   :  { %v451_v9 = vpop.xlane.xlu1 %450  ;;  %v448_v13 = vpop.xlane.xlu0 %447  ;;  %v504_v53 = vsel %vm503_vm7, %v484_v10, %v502_v11 }
 0x414   :  { %v488_v12 = vrot.slane %v448_v13, %v467_v62  ;;  %v492_v14 = vrot.slane %v451_v9, %v467_v62 }
 0x416   :  { %v506_v15 = vsel %vm505_vm8, %v488_v12, %v504_v53 }
 0x417   :  { %v454_v50 = vpop.xlane.xlu0 %453  ;;  %v508_v17 = vsel %vm507_vm9, %v492_v14, %v506_v15 }
 0x418   :  { %v496_v16 = vrot.slane %v454_v50, %v467_v62 }
 0x41a   :  { %v510_v18 = vsel %vm509_vm10, %v496_v16, %v508_v17 }
 0x41b   :  { %512 = vst.msk [vmem:[#allocation2] sm:$0xff] %vm326_vm3, %v510_v18 }
 0x41c   :  { %599 = shalt.err (!%p596_p4)
}
 0x41d   :  { %s600_s23 = scalar_lea.hbm %s789_s2, 128 }
 0x41e   :  { %p601_p5 = scmp.ne.s32.totalorder %s789_s2, %s600_s23  ;;  %p604_p6 = scmp.lt.u32.totalorder %s600_s23, %s789_s2 }
 0x420   :  { %p606_p7 = pnand %p604_p6, %p601_p5 }
 0x422   :  { %609 = shalt.err (!%p606_p7)
}
 0x423   :  { %522 = dma.vmem_to_hbm [thread:$0]  %s520_s19, 128, %s789_s2, [#allocation3]  }
 0x424   :  { %610 = dma.done.wait [#allocation3], 128  }
 0x425   :  { %611 = vsyncadd [#allocation3], 4294967168 }
 0x426   :  { %526 = vsyncpa [#allocation3], 1 }

</bundles_post_ra>
